<compile_context>
chip_gen: v6e
topology: v6e:2x2x1
jax: 0.10.0
libtpu: 0.0.40
codegen_flags: <defaults>
</compile_context>

<pallas_src>
import jax
import jax.numpy as jnp
import numpy as np
from jax.experimental import pallas as pl
from jax.experimental.pallas import tpu as pltpu


# ---------------------------------------------------------------------------
# Kernel builder (handles every combination of residual present / absent)
# ---------------------------------------------------------------------------

def _make_pair_rmsnorm_kernel(has_res0, has_res1, eps, d_real):
    """Build a fused (add +) RMSNorm kernel for two streams in one grid step."""

    inv_d = 1.0 / float(d_real)

    def kernel(*refs):
        it = iter(refs)
        f0_ref = next(it)
        r0_ref = next(it) if has_res0 else None
        f1_ref = next(it)
        r1_ref = next(it) if has_res1 else None
        w_ref = next(it)
        o0_ref = next(it)
        ro0_ref = next(it)
        o1_ref = next(it)
        ro1_ref = next(it)

        w = w_ref[...]                                        # (1, D) fp32

        def one_stream(f_ref, r_ref, o_ref, ro_ref):
            x = f_ref[...].astype(jnp.float32)
            if r_ref is not None:
                # In-kernel cast: free VPU work, avoids wrapper-side astype copy.
                x = x + r_ref[...].astype(jnp.float32)
            ro_ref[...] = x
            # sum/d_real == mean over the *real* feature dim; padded lanes are
            # zero, so this stays correct when D was padded to a lane multiple.
            ms = jnp.sum(x * x, axis=-1, keepdims=True) * inv_d
            inv = jax.lax.rsqrt(ms + eps)
            o_ref[...] = (x * inv * w).astype(o_ref.dtype)

        one_stream(f0_ref, r0_ref, o0_ref, ro0_ref)
        one_stream(f1_ref, r1_ref, o1_ref, ro1_ref)

    return kernel


# ---------------------------------------------------------------------------
# Tiling / VMEM heuristics
# ---------------------------------------------------------------------------

_MAX_ROW_TILE = 4096        # raised from 1024 per perf review


def _round_up(x, m):
    return ((x + m - 1) // m) * m


def _vmem_budgets():
    """Generation-aware (working-set budget, vmem_limit_bytes)."""
    cap = 128 * 1024 * 1024
    try:
        info = pltpu.get_tpu_info()
        cap = int(getattr(info, "vmem_capacity_bytes", cap))
    except Exception:
        pass
    if cap <= 64 * 1024 * 1024:
        # v7x-class: 64 MiB physical VMEM per TensorCore.
        return 24 * 1024 * 1024, 44 * 1024 * 1024
    # v5e / v6e: 128 MiB physical VMEM.
    return 48 * 1024 * 1024, 80 * 1024 * 1024


def _choose_row_tile(n_rows, bytes_per_row, *, max_tl, vmem_budget):
    tl = min(max_tl, max(8, vmem_budget // max(1, bytes_per_row)))
    tl = max(8, (tl // 8) * 8)                 # sublane-align
    if n_rows <= tl:
        return n_rows                          # full-extent block (always legal)
    return tl


# ---------------------------------------------------------------------------
# Wrapper
# ---------------------------------------------------------------------------

def fused_add_rmsnorm_pair(feat0, res0, feat1, res1, weight, *, eps=1e-5,
                           donate_residuals=False, max_rows_per_tile=None):
    """Fused (residual add + RMSNorm) for BOTH feature streams in one pallas_call.

    feat*: (B, L, D) bf16; res*: (B, L, D) fp32/bf16 or None; weight: (D,)
    returns (normed0 bf16, res_out0 fp32, normed1 bf16, res_out1 fp32)
    """
    B, L, D = feat0.shape
    assert feat1.shape == (B, L, D)
    n = B * L

    has_res0 = res0 is not None
    has_res1 = res1 is not None

    # Keep output stores lane-dense: pad D up to a multiple of 128 only when
    # needed (common d_model values are already multiples -> no-op, no copies).
    d_pad = D if D % 128 == 0 else _round_up(D, 128)
    pad_d = d_pad - D

    def prep_feat(f):
        f = f.reshape(n, D)
        if pad_d:
            f = jnp.pad(f, ((0, 0), (0, pad_d)))
        return f

    def prep_res(r):
        r = r.reshape(n, D)                     # keep native dtype; cast in-kernel
        if pad_d:
            r = jnp.pad(r, ((0, 0), (0, pad_d)))
        return r

    f0 = prep_feat(feat0)
    f1 = prep_feat(feat1)
    r0 = prep_res(res0) if has_res0 else None
    r1 = prep_res(res1) if has_res1 else None

    w = weight.astype(jnp.float32)              # pre-cast, hoisted out of kernel
    if pad_d:
        w = jnp.pad(w, (0, pad_d))
    w = w.reshape(1, d_pad)

    # --- VMEM-budgeted row tile (variant-aware: no-residual streams are lighter)
    def stream_bytes(feat, res):
        b = feat.dtype.itemsize + 2 + 4          # in feat + out normed(bf16-ish) + out res(fp32)
        b = feat.dtype.itemsize + feat.dtype.itemsize + 4  # feat in + normed out + res_out
        if res is not None:
            b += res.dtype.itemsize
        return b

    per_row = 2 * (stream_bytes(f0, r0) + stream_bytes(f1, r1)) * d_pad  # double-buffered in/out
    per_row += 2 * 4 * d_pad                    # fp32 temporaries (x0, x1), not double-buffered

    working_budget, vmem_limit = _vmem_budgets()
    max_tl = _MAX_ROW_TILE if max_rows_per_tile is None else min(_MAX_ROW_TILE,
                                                                 int(max_rows_per_tile))
    tl = _choose_row_tile(n, per_row, max_tl=max_tl, vmem_budget=working_budget)
    num_steps = pl.cdiv(n, tl)

    # --- BlockSpecs
    row_idx = lambda i: (i, 0)
    # Very-large-D fallback: don't shrink the tile further, deepen the pipeline.
    deep_pipeline = (d_pad >= 2048) and (tl < 512) and (num_steps > 8)
    if deep_pipeline:
        stream_in_spec = pl.BlockSpec((tl, d_pad), row_idx, pipeline_mode=pl.Buffered(3))
    else:
        stream_in_spec = pl.BlockSpec((tl, d_pad), row_idx)
    stream_out_spec = pl.BlockSpec((tl, d_pad), row_idx)
    w_spec = pl.BlockSpec((1, d_pad), lambda i: (0, 0))

    inputs = [f0]
    in_specs = [stream_in_spec]
    r0_in_idx = None
    if has_res0:
        r0_in_idx = len(inputs)
        inputs.append(r0)
        in_specs.append(stream_in_spec)
    inputs.append(f1)
    in_specs.append(stream_in_spec)
    r1_in_idx = None
    if has_res1:
        r1_in_idx = len(inputs)
        inputs.append(r1)
        in_specs.append(stream_in_spec)
    inputs.append(w)
    in_specs.append(w_spec)

    out_shape = (
        jax.ShapeDtypeStruct((n, d_pad), feat0.dtype),   # normed0
        jax.ShapeDtypeStruct((n, d_pad), jnp.float32),   # residual_out0
        jax.ShapeDtypeStruct((n, d_pad), feat1.dtype),   # normed1
        jax.ShapeDtypeStruct((n, d_pad), jnp.float32),   # residual_out1
    )
    out_specs = [stream_out_spec, stream_out_spec, stream_out_spec, stream_out_spec]

    # Optional: write residual_out in place of the dead fp32 residual inputs.
    io_aliases = {}
    if donate_residuals and pad_d == 0:
        if has_res0 and r0.dtype == jnp.float32:
            io_aliases[r0_in_idx] = 1
        if has_res1 and r1.dtype == jnp.float32:
            io_aliases[r1_in_idx] = 3

    kernel = _make_pair_rmsnorm_kernel(has_res0, has_res1, float(eps), D)

    n0, ro0, n1, ro1 = pl.pallas_call(
        kernel,
        out_shape=out_shape,
        grid_spec=pltpu.PrefetchScalarGridSpec(
            num_scalar_prefetch=0,
            grid=(num_steps,),
            in_specs=in_specs,
            out_specs=out_specs,
        ),
        compiler_params=pltpu.CompilerParams(
            dimension_semantics=("parallel",),
            vmem_limit_bytes=vmem_limit,
        ),
        input_output_aliases=io_aliases,
    )(*inputs)

    def unprep(x):
        if pad_d:
            x = x[:, :D]
        return x.reshape(B, L, D)

    return unprep(n0), unprep(ro0), unprep(n1), unprep(ro1)


def block_forward(feat_c0, residual_0, feat_c1, residual_1, norm_weight,
                  *, eps=1e-5, switch=False, dims=None):
    """JAX/Pallas equivalent of Block.forward (fused_add_norm path).

    drop_path is identity at inference (drop_path=0 / eval), so it is omitted.
    """
    feat_c0, residual_0, feat_c1, residual_1 = fused_add_rmsnorm_pair(
        feat_c0, residual_0, feat_c1, residual_1, norm_weight, eps=eps)

    # TODO(synk): the inner `self.model` (injected Mamba mixer constructor, not
    # defined in this module) is treated as identity on (u_0, u_1).
    #
    # Because the mixer is identity, the `switch` (H W)->(W H) permutation and
    # its inverse cancel exactly, so we elide both HBM round-trips. With a real
    # mixer, fold the permutation into the mixer kernel's BlockSpec index_map
    # instead of materializing XLA transposes.
    del switch, dims
    features = (feat_c0, feat_c1)

    return features[0], features[1], residual_0, residual_1


# ---------------------------------------------------------------------------
# Pure-JAX reference
# ---------------------------------------------------------------------------

def _reference_fused_add_rmsnorm(feat, residual, weight, eps):
    x = feat.astype(jnp.float32)
    if residual is not None:
        x = x + residual.astype(jnp.float32)
    inv = jax.lax.rsqrt(jnp.mean(x * x, axis=-1, keepdims=True) + eps)
    y = (x * inv * weight.astype(jnp.float32)[None, None, :]).astype(feat.dtype)
    return y, x


def _check_pair(outs, feats, ress, weight, eps):
    f0, r0, f1, r1 = outs
    ref_f0, ref_r0 = _reference_fused_add_rmsnorm(feats[0], ress[0], weight, eps)
    ref_f1, ref_r1 = _reference_fused_add_rmsnorm(feats[1], ress[1], weight, eps)
    np.testing.assert_allclose(np.asarray(r0), np.asarray(ref_r0), rtol=1e-5, atol=1e-5)
    np.testing.assert_allclose(np.asarray(r1), np.asarray(ref_r1), rtol=1e-5, atol=1e-5)
    np.testing.assert_allclose(np.asarray(f0, np.float32), np.asarray(ref_f0, np.float32),
                               rtol=2e-2, atol=2e-2)
    np.testing.assert_allclose(np.asarray(f1, np.float32), np.asarray(ref_f1, np.float32),
                               rtol=2e-2, atol=2e-2)


if __name__ == "__main__":
    key = jax.random.PRNGKey(0)
    # NOTE: confirm eps matches the PyTorch RMSNorm eps (mamba_ssm default 1e-5).
    eps = 1e-5

    B, L, D = 2, 64, 128          # small shapes: batch=2, seq=64, d_model=128
    k0, k1, k2, k3, kw = jax.random.split(key, 5)
    feat_c0 = jax.random.normal(k0, (B, L, D), jnp.bfloat16)
    feat_c1 = jax.random.normal(k1, (B, L, D), jnp.bfloat16)
    residual_0 = jax.random.normal(k2, (B, L, D), jnp.float32)
    residual_1 = jax.random.normal(k3, (B, L, D), jnp.float32)
    # RMSNorm weight initialized to ones in the module; perturb slightly so the
    # scaling is exercised.
    norm_weight = (jnp.ones((D,), jnp.float32)
                   + 0.01 * jax.random.normal(kw, (D,), jnp.float32)).astype(jnp.bfloat16)

    # --- path 1: residuals present ---------------------------------------
    f0, f1, r0, r1 = block_forward(feat_c0, residual_0, feat_c1, residual_1,
                                   norm_weight, eps=eps, switch=False)
    jax.block_until_ready((f0, f1, r0, r1))
    _check_pair((f0, r0, f1, r1), (feat_c0, feat_c1), (residual_0, residual_1),
                norm_weight, eps)
    assert f0.shape == (B, L, D) and f0.dtype == jnp.bfloat16
    assert r0.shape == (B, L, D) and r0.dtype == jnp.float32

    # --- path 2: residual=None (first block) — no-residual kernel variant -
    g0, g1, s0, s1 = block_forward(feat_c0, None, feat_c1, None,
                                   norm_weight, eps=eps, switch=False)
    jax.block_until_ready((g0, g1, s0, s1))
    _check_pair((g0, s0, g1, s1), (feat_c0, feat_c1), (None, None), norm_weight, eps)

    # --- path 3: mixed (res0 present, res1 None) — per-stream variants ----
    m0, m1, t0, t1 = block_forward(feat_c0, residual_0, feat_c1, None,
                                   norm_weight, eps=eps, switch=False)
    jax.block_until_ready((m0, m1, t0, t1))
    _check_pair((m0, t0, m1, t1), (feat_c0, feat_c1), (residual_0, None),
                norm_weight, eps)

    # --- path 4: switch=True (identity mixer => permutation cancels) ------
    h0, h1, u0, u1 = block_forward(feat_c0, residual_0, feat_c1, residual_1,
                                   norm_weight, eps=eps, switch=True, dims=(8, 8, 8, 8))
    jax.block_until_ready((h0, h1, u0, u1))
    np.testing.assert_allclose(np.asarray(h0, np.float32), np.asarray(f0, np.float32))
    np.testing.assert_allclose(np.asarray(u0), np.asarray(r0))

    # --- path 5: multi-step grid with a partial last row tile -------------
    B2, L2 = 2, 516               # n = 1032 rows, forced 256-row tiles -> 5 steps
    j0, j1, j2, j3 = jax.random.split(jax.random.PRNGKey(1), 4)
    fa = jax.random.normal(j0, (B2, L2, D), jnp.bfloat16)
    fb = jax.random.normal(j1, (B2, L2, D), jnp.bfloat16)
    ra = jax.random.normal(j2, (B2, L2, D), jnp.float32)
    rb = jax.random.normal(j3, (B2, L2, D), jnp.float32)
    pf0, pr0, pf1, pr1 = fused_add_rmsnorm_pair(fa, ra, fb, rb, norm_weight,
                                                eps=eps, max_rows_per_tile=256)
    jax.block_until_ready((pf0, pr0, pf1, pr1))
    _check_pair((pf0, pr0, pf1, pr1), (fa, fb), (ra, rb), norm_weight, eps)

    # --- path 6: D not a multiple of 128 (lane-padding fallback) ----------
    D3 = 96
    q0, q1, q2, q3, qw = jax.random.split(jax.random.PRNGKey(2), 5)
    fc = jax.random.normal(q0, (B, L, D3), jnp.bfloat16)
    fd = jax.random.normal(q1, (B, L, D3), jnp.bfloat16)
    rc = jax.random.normal(q2, (B, L, D3), jnp.float32)
    rd = jax.random.normal(q3, (B, L, D3), jnp.float32)
    w3 = (jnp.ones((D3,), jnp.float32)
          + 0.01 * jax.random.normal(qw, (D3,), jnp.float32)).astype(jnp.bfloat16)
    nf0, nr0, nf1, nr1 = fused_add_rmsnorm_pair(fc, rc, fd, rd, w3, eps=eps)
    jax.block_until_ready((nf0, nr0, nf1, nr1))
    _check_pair((nf0, nr0, nf1, nr1), (fc, fd), (rc, rd), w3, eps)

    print("KERNEL_OK")
</pallas_src>

<mosaic_0001>
module attributes {stable_mosaic.version = 11 : i64} {
  func.func @kernel(%arg0: i32, %arg1: memref<128x128xbf16, #tpu.memory_space<vmem>>, %arg2: memref<128x128xf32, #tpu.memory_space<vmem>>, %arg3: memref<128x128xbf16, #tpu.memory_space<vmem>>, %arg4: memref<128x128xf32, #tpu.memory_space<vmem>>, %arg5: memref<1x128xf32, #tpu.memory_space<vmem>>, %arg6: memref<128x128xbf16, #tpu.memory_space<vmem>>, %arg7: memref<128x128xf32, #tpu.memory_space<vmem>>, %arg8: memref<128x128xbf16, #tpu.memory_space<vmem>>, %arg9: memref<128x128xf32, #tpu.memory_space<vmem>>) attributes {dimension_semantics = [#tpu.dimension_semantics<parallel>], iteration_bounds = array<i64: 1>, scalar_prefetch = 0 : i64, scratch_operands = 0 : i64, tpu.core_type = #tpu.core_type<tc>, window_params = [{transform_indices = @transform_0, window_bounds = array<i64: 128, 128>}, {transform_indices = @transform_1, window_bounds = array<i64: 128, 128>}, {transform_indices = @transform_2, window_bounds = array<i64: 128, 128>}, {transform_indices = @transform_3, window_bounds = array<i64: 128, 128>}, {pipeline_mode = #tpu.pipeline_mode<synchronous>, transform_indices = @transform_4, window_bounds = array<i64: 1, 128>}, {transform_indices = @transform_5, window_bounds = array<i64: 128, 128>}, {transform_indices = @transform_6, window_bounds = array<i64: 128, 128>}, {transform_indices = @transform_7, window_bounds = array<i64: 128, 128>}, {transform_indices = @transform_8, window_bounds = array<i64: 128, 128>}]} {
    %c0 = arith.constant 0 : index
    %c0_0 = arith.constant 0 : index
    %0 = vector.load %arg5[%c0, %c0_0] : memref<1x128xf32, #tpu.memory_space<vmem>>, vector<1x128xf32>
    %c0_1 = arith.constant 0 : index
    %c0_2 = arith.constant 0 : index
    %1 = vector.load %arg1[%c0_1, %c0_2] : memref<128x128xbf16, #tpu.memory_space<vmem>>, vector<128x128xbf16>
    %2 = arith.extf %1 : vector<128x128xbf16> to vector<128x128xf32>
    %c0_3 = arith.constant 0 : index
    %c0_4 = arith.constant 0 : index
    %3 = vector.load %arg2[%c0_3, %c0_4] : memref<128x128xf32, #tpu.memory_space<vmem>>, vector<128x128xf32>
    %4 = arith.addf %2, %3 : vector<128x128xf32>
    %c0_5 = arith.constant 0 : index
    %c0_6 = arith.constant 0 : index
    %5 = vector.load %arg7[%c0_5, %c0_6] : memref<128x128xf32, #tpu.memory_space<vmem>>, vector<128x128xf32>
    tpu.vector_store %arg7[%c0_5, %c0_6], %4 {strides = array<i32>} : memref<128x128xf32, #tpu.memory_space<vmem>>, vector<128x128xf32>,
    %6 = arith.mulf %4, %4 : vector<128x128xf32>
    %cst = arith.constant dense<0.000000e+00> : vector<128xf32>
    %7 = vector.multi_reduction <add>, %6, %cst [1] : vector<128x128xf32> to vector<128xf32>
    %8 = vector.shape_cast %7 : vector<128xf32> to vector<128x1xf32>
    %cst_7 = arith.constant 7.812500e-03 : f32
    %9 = vector.broadcast %cst_7 : f32 to vector<128x1xf32>
    %10 = arith.mulf %8, %9 : vector<128x1xf32>
    %cst_8 = arith.constant 9.99999974E-6 : f32
    %11 = vector.broadcast %cst_8 : f32 to vector<128x1xf32>
    %12 = arith.addf %10, %11 : vector<128x1xf32>
    %13 = math.rsqrt %12 : vector<128x1xf32>
    %14 = vector.broadcast %13 : vector<128x1xf32> to vector<128x128xf32>
    %15 = arith.mulf %4, %14 : vector<128x128xf32>
    %16 = vector.broadcast %0 : vector<1x128xf32> to vector<128x128xf32>
    %17 = arith.mulf %15, %16 : vector<128x128xf32>
    %18 = arith.truncf %17 : vector<128x128xf32> to vector<128x128xbf16>
    %c0_9 = arith.constant 0 : index
    %c0_10 = arith.constant 0 : index
    %19 = vector.load %arg6[%c0_9, %c0_10] : memref<128x128xbf16, #tpu.memory_space<vmem>>, vector<128x128xbf16>
    tpu.vector_store %arg6[%c0_9, %c0_10], %18 {strides = array<i32>} : memref<128x128xbf16, #tpu.memory_space<vmem>>, vector<128x128xbf16>,
    %c0_11 = arith.constant 0 : index
    %c0_12 = arith.constant 0 : index
    %20 = vector.load %arg3[%c0_11, %c0_12] : memref<128x128xbf16, #tpu.memory_space<vmem>>, vector<128x128xbf16>
    %21 = arith.extf %20 : vector<128x128xbf16> to vector<128x128xf32>
    %c0_13 = arith.constant 0 : index
    %c0_14 = arith.constant 0 : index
    %22 = vector.load %arg4[%c0_13, %c0_14] : memref<128x128xf32, #tpu.memory_space<vmem>>, vector<128x128xf32>
    %23 = arith.addf %21, %22 : vector<128x128xf32>
    %c0_15 = arith.constant 0 : index
    %c0_16 = arith.constant 0 : index
    %24 = vector.load %arg9[%c0_15, %c0_16] : memref<128x128xf32, #tpu.memory_space<vmem>>, vector<128x128xf32>
    tpu.vector_store %arg9[%c0_15, %c0_16], %23 {strides = array<i32>} : memref<128x128xf32, #tpu.memory_space<vmem>>, vector<128x128xf32>,
    %25 = arith.mulf %23, %23 : vector<128x128xf32>
    %cst_17 = arith.constant dense<0.000000e+00> : vector<128xf32>
    %26 = vector.multi_reduction <add>, %25, %cst_17 [1] : vector<128x128xf32> to vector<128xf32>
    %27 = vector.shape_cast %26 : vector<128xf32> to vector<128x1xf32>
    %cst_18 = arith.constant 7.812500e-03 : f32
    %28 = vector.broadcast %cst_18 : f32 to vector<128x1xf32>
    %29 = arith.mulf %27, %28 : vector<128x1xf32>
    %cst_19 = arith.constant 9.99999974E-6 : f32
    %30 = vector.broadcast %cst_19 : f32 to vector<128x1xf32>
    %31 = arith.addf %29, %30 : vector<128x1xf32>
    %32 = math.rsqrt %31 : vector<128x1xf32>
    %33 = vector.broadcast %32 : vector<128x1xf32> to vector<128x128xf32>
    %34 = arith.mulf %23, %33 : vector<128x128xf32>
    %35 = vector.broadcast %0 : vector<1x128xf32> to vector<128x128xf32>
    %36 = arith.mulf %34, %35 : vector<128x128xf32>
    %37 = arith.truncf %36 : vector<128x128xf32> to vector<128x128xbf16>
    %c0_20 = arith.constant 0 : index
    %c0_21 = arith.constant 0 : index
    %38 = vector.load %arg8[%c0_20, %c0_21] : memref<128x128xbf16, #tpu.memory_space<vmem>>, vector<128x128xbf16>
    tpu.vector_store %arg8[%c0_20, %c0_21], %37 {strides = array<i32>} : memref<128x128xbf16, #tpu.memory_space<vmem>>, vector<128x128xbf16>,
    return
  }
  func.func @transform_0(%arg0: i32) -> (i32, i32) {
    %c0_i32 = arith.constant 0 : i32
    %c0_i32_0 = arith.constant 0 : i32
    return %arg0, %c0_i32 : i32, i32
  }
  func.func @transform_1(%arg0: i32) -> (i32, i32) {
    %c0_i32 = arith.constant 0 : i32
    %c0_i32_0 = arith.constant 0 : i32
    return %arg0, %c0_i32 : i32, i32
  }
  func.func @transform_2(%arg0: i32) -> (i32, i32) {
    %c0_i32 = arith.constant 0 : i32
    %c0_i32_0 = arith.constant 0 : i32
    return %arg0, %c0_i32 : i32, i32
  }
  func.func @transform_3(%arg0: i32) -> (i32, i32) {
    %c0_i32 = arith.constant 0 : i32
    %c0_i32_0 = arith.constant 0 : i32
    return %arg0, %c0_i32 : i32, i32
  }
  func.func @transform_4(%arg0: i32) -> (i32, i32) {
    %c0_i32 = arith.constant 0 : i32
    %c0_i32_0 = arith.constant 0 : i32
    %c0_i32_1 = arith.constant 0 : i32
    return %c0_i32, %c0_i32_0 : i32, i32
  }
  func.func @transform_5(%arg0: i32) -> (i32, i32) {
    %c0_i32 = arith.constant 0 : i32
    %c0_i32_0 = arith.constant 0 : i32
    return %arg0, %c0_i32 : i32, i32
  }
  func.func @transform_6(%arg0: i32) -> (i32, i32) {
    %c0_i32 = arith.constant 0 : i32
    %c0_i32_0 = arith.constant 0 : i32
    return %arg0, %c0_i32 : i32, i32
  }
  func.func @transform_7(%arg0: i32) -> (i32, i32) {
    %c0_i32 = arith.constant 0 : i32
    %c0_i32_0 = arith.constant 0 : i32
    return %arg0, %c0_i32 : i32, i32
  }
  func.func @transform_8(%arg0: i32) -> (i32, i32) {
    %c0_i32 = arith.constant 0 : i32
    %c0_i32_0 = arith.constant 0 : i32
    return %arg0, %c0_i32 : i32, i32
  }
}

</mosaic_0001>

<bundles_post_ra>
// kernel: tpu_custom_call.1
= control target key start
LH: loop header
LB: loop body
LE: loop exit
PB: predicated region body
PF: predicated region fallthrough
CT: control target
= control target key end

     0   :  { %14 = vsyncpa [#allocation3], 0  ;;  %s1550_s0 = inlined_call_operand.hbm [shape: bf16[128,128], index: 0, kind: input, shape index: {}]   ;;  %s1551_s1 = inlined_call_operand.hbm [shape: f32[128,128], index: 1, kind: input, shape index: {}]   ;;  %s1552_s2 = inlined_call_operand.hbm [shape: bf16[128,128], index: 2, kind: input, shape index: {}]   ;;  %s1553_s3 = inlined_call_operand.hbm [shape: f32[128,128], index: 3, kind: input, shape index: {}]   ;;  %s1554_s4 = inlined_call_operand.vmem [shape: f32[1,128], index: 4, kind: input, shape index: {}]   ;;  %s1555_s5 = inlined_call_operand.hbm [shape: bf16[128,128], index: 5, kind: output, shape index: {0}]   ;;  %s1556_s6 = inlined_call_operand.hbm [shape: f32[128,128], index: 6, kind: output, shape index: {1}]   ;;  %s1557_s7 = inlined_call_operand.hbm [shape: bf16[128,128], index: 7, kind: output, shape index: {2}]   ;;  %s1558_s8 = inlined_call_operand.hbm [shape: f32[128,128], index: 8, kind: output, shape index: {3}]  }
   0x1   :  { %15 = vsyncpa [#allocation6], 0 }
   0x2   :  { %16 = vsyncpa [#allocation9], 0 }
   0x3   :  { %17 = vsyncpa [#allocation4], 0 }
   0x4   :  { %18 = vsyncpa [#allocation12], 0 }
   0x5   :  { %19 = vsyncpa [#allocation15], 0  ;;  %s1216_s27 = smov [#allocation5]  }
   0x6   :  { %s37_s28 = sshll.u32 %s1216_s27, 4  ;;  %s38_s28 = int_to_ptr.vmem [resolvable:$true] %s37_s28 }
   0x7   :  { %s1052_s29 = scalar_lea.vmem %s38_s28, 2048  ;;  %p1057_p1 = scmp.lt.s32.totalorder %s38_s28, %s38_s28 }
   0x8   :  { %p1053_p0 = scmp.ne.s32.totalorder %s38_s28, %s1052_s29  ;;  %p1058_p2 = scmp.lt.s32.totalorder %s1052_s29, %s1052_s29 }
   0xa   :  { %p1059_p3 = por %p1058_p2, %p1057_p1 }
   0xc   :  { %p1060_p4 = pnand %p1059_p3, %p1053_p0 }
   0xe   :  { %1063 = shalt.err (!%p1060_p4)
}
   0xf   :  { %s1217_s30 = smov 128   ;;  %s1218_s9 = smov 8  }
  0x10   :  { %43 = dma.hbm_to_vmem [thread:$0]  %s1551_s1, 2048, %s38_s28, [#allocation6], %s1217_s30, %s1217_s30, %s1218_s9  }
  0x11   :  { %s1219_s12 = smov [#allocation2]  }
  0x12   :  { %s25_s13 = sshll.u32 %s1219_s12, 4  ;;  %s26_s13 = int_to_ptr.vmem [resolvable:$true] %s25_s13 }
  0x13   :  { %s1072_s14 = scalar_lea.vmem %s26_s13, 1024  ;;  %p1077_p6 = scmp.lt.s32.totalorder %s26_s13, %s26_s13 }
  0x14   :  { %p1073_p5 = scmp.ne.s32.totalorder %s26_s13, %s1072_s14  ;;  %p1078_p7 = scmp.lt.s32.totalorder %s1072_s14, %s1072_s14 }
  0x16   :  { %p1079_p8 = por %p1078_p7, %p1077_p6 }
  0x18   :  { %p1080_p9 = pnand %p1079_p8, %p1073_p5 }
  0x1a   :  { %1083 = shalt.err (!%p1080_p9)
}
  0x1b   :  { %s1220_s15 = smov 64   ;;  %s1221_s16 = smov 4  }
  0x1c   :  { %31 = dma.hbm_to_vmem [thread:$0]  %s1550_s0, 1024, %s26_s13, [#allocation3], %s1220_s15, %s1220_s15, %s1221_s16  }
  0x1d   :  { %s1222_s1 = smov [#allocation7]   ;;  %s1223_s20 = smov [#allocation8]  }
  0x1e   :  { %s49_s19 = sshll.u32 %s1222_s1, 4  ;;  %s61_s21 = sshll.u32 %s1223_s20, 4  ;;  %s50_s19 = int_to_ptr.vmem [resolvable:$true] %s49_s19  ;;  %s62_s21 = int_to_ptr.vmem [resolvable:$true] %s61_s21 }
  0x1f   :  { %s1092_s22 = scalar_lea.vmem %s50_s19, 1024  ;;  %p1097_p11 = scmp.lt.s32.totalorder %s50_s19, %s50_s19 }
  0x20   :  { %p1093_p10 = scmp.ne.s32.totalorder %s50_s19, %s1092_s22  ;;  %p1098_p12 = scmp.lt.s32.totalorder %s1092_s22, %s1092_s22 }
  0x22   :  { %p1099_p13 = por %p1098_p12, %p1097_p11 }
  0x24   :  { %p1100_p0 = pnand %p1099_p13, %p1093_p10 }
  0x26   :  { %1103 = shalt.err (!%p1100_p0)
}
  0x27   :  { %55 = dma.hbm_to_vmem [thread:$0]  %s1552_s2, 1024, %s50_s19, [#allocation6], %s1220_s15, %s1220_s15, %s1221_s16  }
  0x28   :  { %s1112_s0 = scalar_lea.vmem %s62_s21, 2048  ;;  %p1117_p2 = scmp.lt.s32.totalorder %s62_s21, %s62_s21 }
  0x29   :  { %p1113_p1 = scmp.ne.s32.totalorder %s62_s21, %s1112_s0  ;;  %p1118_p3 = scmp.lt.s32.totalorder %s1112_s0, %s1112_s0 }
  0x2b   :  { %p1119_p4 = por %p1118_p3, %p1117_p2 }
  0x2d   :  { %p1120_p5 = pnand %p1119_p4, %p1113_p1 }
  0x2f   :  { %1123 = shalt.err (!%p1120_p5)
}
  0x30   :  { %67 = dma.hbm_to_vmem [thread:$0]  %s1553_s3, 2048, %s62_s21, [#allocation9], %s1217_s30, %s1217_s30, %s1218_s9  }
  0x31   :  { %1204 = dma.done.wait [#allocation3], 1024  }
  0x32   :  { %1205 = vsyncadd [#allocation3], 4294966272 }
  0x33   :  { %1206 = dma.done.wait [#allocation6], 3072  }
  0x34   :  { %1207 = vsyncadd [#allocation6], 4294964224 }
  0x35   :  { %1208 = dma.done.wait [#allocation9], 2048  }
  0x36   :  { %1209 = vsyncadd [#allocation9], 4294965248  ;;  %v940_v0 = vld [vmem:[#allocation2 + $0x8] sm:$0xff]   ;;  %v117_v1 = vld [vmem:[#allocation5 + $0x10] sm:$0xff]  ;;  %s1224_s2 = smov [#allocation11]  }
  0x37   :  { %v797_v2 = vld [vmem:[#allocation2] sm:$0xff]   ;;  %v802_v3 = vunpack.c.l.bf16 %v940_v0  ;;  %v803_v6 = vunpack.c.h.bf16 %v940_v0  ;;  %v118_v7 = vld [vmem:[#allocation5 + $0x18] sm:$0xff]  ;;  %v116_v9 = vld [vmem:[#allocation5 + $0x8] sm:$0xff]  ;;  %s682_s3 = sshll.u32 %s1224_s2, 4  ;;  %s683_s3 = int_to_ptr.vmem [resolvable:$true] %s682_s3 }
  0x38   :  { %v798_v4 = vunpack.c.l.bf16 %v797_v2  ;;  %v115_v5 = vld [vmem:[#allocation5] sm:$0xff]  ;;  %v799_v8 = vunpack.c.h.bf16 %v797_v2  ;;  %v941_v10 = vld [vmem:[#allocation2 + $0x10] sm:$0xff]   ;;  %v120_v11 = vld [vmem:[#allocation5 + $0x28] sm:$0xff]  ;;  %s1124_s27 = scalar_lea.vmem %s683_s3, 2048  ;;  %p1129_p7 = scmp.lt.s32.totalorder %s683_s3, %s683_s3 }
  0x39   :  { %v119_v12 = vld [vmem:[#allocation5 + $0x20] sm:$0xff]  ;;  %v1297_v13 = vadd.f32 %v802_v3, %v117_v1  ;;  %v1301_v15 = vadd.f32 %v803_v6, %v118_v7  ;;  %v942_v17 = vld [vmem:[#allocation2 + $0x18] sm:$0xff]   ;;  %v121_v19 = vld [vmem:[#allocation5 + $0x30] sm:$0xff]  ;;  %v807_v20 = vunpack.c.h.bf16 %v941_v10  ;;  %v806_v21 = vunpack.c.l.bf16 %v941_v10  ;;  %p1125_p6 = scmp.ne.s32.totalorder %s683_s3, %s1124_s27  ;;  %p1130_p8 = scmp.lt.s32.totalorder %s1124_s27, %s1124_s27 }
  0x3a   :  { %v1299_v14 = vadd.f32 %v798_v4, %v115_v5  ;;  %v1303_v16 = vadd.f32 %v799_v8, %v116_v9  ;;  %v122_v18 = vld [vmem:[#allocation5 + $0x38] sm:$0xff]  ;;  %v811_v22 = vunpack.c.h.bf16 %v942_v17  ;;  %v810_v23 = vunpack.c.l.bf16 %v942_v17  ;;  %v943_v24 = vld [vmem:[#allocation2 + $0x20] sm:$0xff]   ;;  %v124_v29 = vld [vmem:[#allocation5 + $0x48] sm:$0xff] }
  0x3b   :  { %v165_v25 = vmul.f32 %v1297_v13, %v1297_v13  ;;  %149 = vst [vmem:[#allocation11 + $0x10] sm:$0xff] %v1297_v13  ;;  %150 = vst [vmem:[#allocation11 + $0x18] sm:$0xff] %v1301_v15  ;;  %v166_v27 = vmul.f32 %v1301_v15, %v1301_v15  ;;  %v944_v30 = vld [vmem:[#allocation2 + $0x28] sm:$0xff]   ;;  %v1317_v31 = vadd.f32 %v807_v20, %v120_v11  ;;  %v123_v35 = vld [vmem:[#allocation5 + $0x40] sm:$0xff]  ;;  %v815_v38 = vunpack.c.h.bf16 %v943_v24  ;;  %p1131_p9 = por %p1130_p8, %p1129_p7 }
  0x3c   :  { %v163_v26 = vmul.f32 %v1299_v14, %v1299_v14  ;;  %147 = vst [vmem:[#allocation11] sm:$0xff] %v1299_v14  ;;  %148 = vst [vmem:[#allocation11 + $0x8] sm:$0xff] %v1303_v16  ;;  %v164_v28 = vmul.f32 %v1303_v16, %v1303_v16  ;;  %v1319_v32 = vadd.f32 %v806_v21, %v119_v12  ;;  %v126_v36 = vld [vmem:[#allocation5 + $0x58] sm:$0xff]  ;;  %v125_v37 = vld [vmem:[#allocation5 + $0x50] sm:$0xff]  ;;  %v814_v39 = vunpack.c.l.bf16 %v943_v24 }
  0x3d   :  { %v1321_v33 = vadd.f32 %v811_v22, %v122_v18  ;;  %v1323_v34 = vadd.f32 %v810_v23, %v121_v19  ;;  %183 = vadd.xlane.f32.xlu1 %v165_v25  ;;  %v819_v40 = vunpack.c.h.bf16 %v944_v30  ;;  %v818_v41 = vunpack.c.l.bf16 %v944_v30  ;;  %v945_v42 = vld [vmem:[#allocation2 + $0x30] sm:$0xff]   ;;  %v946_v43 = vld [vmem:[#allocation2 + $0x38] sm:$0xff]   ;;  %152 = vst [vmem:[#allocation11 + $0x28] sm:$0xff] %v1317_v31  ;;  %v869_v44 = vld [vmem:[#allocation7] sm:$0xff]   ;;  %p1132_p10 = pnand %p1131_p9, %p1125_p6 }
  0x3e   :  { %179 = vadd.xlane.f32.xlu0 %v163_v26  ;;  %151 = vst [vmem:[#allocation11 + $0x20] sm:$0xff] %v1319_v32  ;;  %v1329_v45 = vadd.f32 %v815_v38, %v124_v29  ;;  %v1331_v46 = vadd.f32 %v814_v39, %v123_v35  ;;  %v128_v49 = vld [vmem:[#allocation5 + $0x68] sm:$0xff]  ;;  %v127_v50 = vld [vmem:[#allocation5 + $0x60] sm:$0xff]  ;;  %v130_v51 = vld [vmem:[#allocation5 + $0x78] sm:$0xff]  ;;  %v823_v52 = vunpack.c.h.bf16 %v945_v42  ;;  %v822_v53 = vunpack.c.l.bf16 %v945_v42 }
  0x3f   :  { %154 = vst [vmem:[#allocation11 + $0x38] sm:$0xff] %v1321_v33  ;;  %153 = vst [vmem:[#allocation11 + $0x30] sm:$0xff] %v1323_v34  ;;  %v1333_v47 = vadd.f32 %v819_v40, %v126_v36  ;;  %v1335_v48 = vadd.f32 %v818_v41, %v125_v37  ;;  %v827_v54 = vunpack.c.h.bf16 %v946_v43  ;;  %v826_v55 = vunpack.c.l.bf16 %v946_v43  ;;  %v129_v56 = vld [vmem:[#allocation5 + $0x70] sm:$0xff]  ;;  %v410_v57 = vld [vmem:[#allocation8 + $0x8] sm:$0xff] }
  0x40   :  { %v954_v58 = vld [vmem:[#allocation7 + $0x8] sm:$0xff]   ;;  %v168_v59 = vmul.f32 %v1317_v31, %v1317_v31  ;;  %v167_v60 = vmul.f32 %v1319_v32, %v1319_v32  ;;  %156 = vst [vmem:[#allocation11 + $0x48] sm:$0xff] %v1329_v45  ;;  %155 = vst [vmem:[#allocation11 + $0x40] sm:$0xff] %v1331_v46  ;;  %v871_v61 = vunpack.c.h.bf16 %v869_v44  ;;  %v1345_v62 = vadd.f32 %v823_v52, %v128_v49  ;;  %v409_v1 = vld [vmem:[#allocation8] sm:$0xff] }
  0x41   :  { %185 = vadd.xlane.f32.xlu1 %v166_v27  ;;  %158 = vst [vmem:[#allocation11 + $0x58] sm:$0xff] %v1333_v47  ;;  %157 = vst [vmem:[#allocation11 + $0x50] sm:$0xff] %v1335_v48  ;;  %v1347_v63 = vadd.f32 %v822_v53, %v127_v50  ;;  %v1349_v0 = vadd.f32 %v827_v54, %v130_v51  ;;  %v955_v2 = vld [vmem:[#allocation7 + $0x10] sm:$0xff]   ;;  %v1351_v3 = vadd.f32 %v826_v55, %v129_v56  ;;  %v412_v7 = vld [vmem:[#allocation8 + $0x18] sm:$0xff] }
  0x42   :  { %181 = vadd.xlane.f32.xlu0 %v164_v28  ;;  %v1353_v4 = vadd.f32 %v871_v61, %v410_v57  ;;  %v870_v5 = vunpack.c.l.bf16 %v869_v44  ;;  %v875_v6 = vunpack.c.h.bf16 %v954_v58  ;;  %v411_v8 = vld [vmem:[#allocation8 + $0x10] sm:$0xff]  ;;  %v956_v9 = vld [vmem:[#allocation7 + $0x18] sm:$0xff]   ;;  %160 = vst [vmem:[#allocation11 + $0x68] sm:$0xff] %v1345_v62  ;;  %v874_v10 = vunpack.c.l.bf16 %v954_v58  ;;  %v414_v11 = vld [vmem:[#allocation8 + $0x28] sm:$0xff] }
  0x43   :  { %159 = vst [vmem:[#allocation11 + $0x60] sm:$0xff] %v1347_v63  ;;  %162 = vst [vmem:[#allocation11 + $0x78] sm:$0xff] %v1349_v0  ;;  %v957_v12 = vld [vmem:[#allocation7 + $0x20] sm:$0xff]   ;;  %v170_v17 = vmul.f32 %v1321_v33, %v1321_v33  ;;  %v169_v18 = vmul.f32 %v1323_v34, %v1323_v34  ;;  %v879_v20 = vunpack.c.h.bf16 %v955_v2  ;;  %v416_v22 = vld [vmem:[#allocation8 + $0x38] sm:$0xff]  ;;  %v878_v25 = vunpack.c.l.bf16 %v955_v2 }
  0x44   :  { %161 = vst [vmem:[#allocation11 + $0x70] sm:$0xff] %v1351_v3  ;;  %442 = vst [vmem:[#allocation14 + $0x8] sm:$0xff] %v1353_v4  ;;  %v1364_v19 = vadd.f32 %v870_v5, %v409_v1  ;;  %v413_v21 = vld [vmem:[#allocation8 + $0x20] sm:$0xff]  ;;  %v1366_v23 = vadd.f32 %v875_v6, %v412_v7  ;;  %v1368_v24 = vadd.f32 %v874_v10, %v411_v8  ;;  %v883_v26 = vunpack.c.h.bf16 %v956_v9  ;;  %v415_v27 = vld [vmem:[#allocation8 + $0x30] sm:$0xff] }
  0x45   :  { %189 = vadd.xlane.f32.xlu1 %v168_v59  ;;  %v418_v28 = vld [vmem:[#allocation8 + $0x48] sm:$0xff]  ;;  %v1371_v29 = vadd.f32 %v879_v20, %v414_v11  ;;  %v882_v30 = vunpack.c.l.bf16 %v956_v9  ;;  %v887_v35 = vunpack.c.h.bf16 %v957_v12  ;;  %v172_v37 = vmul.f32 %v1329_v45, %v1329_v45  ;;  %v417_v40 = vld [vmem:[#allocation8 + $0x40] sm:$0xff]  ;;  %v959_v41 = vld [vmem:[#allocation7 + $0x30] sm:$0xff]  }
  0x46   :  { %187 = vadd.xlane.f32.xlu0 %v167_v60  ;;  %441 = vst [vmem:[#allocation14] sm:$0xff] %v1364_v19  ;;  %v958_v36 = vld [vmem:[#allocation7 + $0x28] sm:$0xff]   ;;  %444 = vst [vmem:[#allocation14 + $0x18] sm:$0xff] %v1366_v23  ;;  %v1377_v38 = vadd.f32 %v878_v25, %v413_v21  ;;  %v1379_v39 = vadd.f32 %v883_v26, %v416_v22  ;;  %v171_v42 = vmul.f32 %v1331_v46, %v1331_v46  ;;  %v420_v50 = vld [vmem:[#allocation8 + $0x58] sm:$0xff] }
  0x47   :  { %443 = vst [vmem:[#allocation14 + $0x10] sm:$0xff] %v1368_v24  ;;  %446 = vst [vmem:[#allocation14 + $0x28] sm:$0xff] %v1371_v29  ;;  %v1384_v43 = vadd.f32 %v882_v30, %v415_v27  ;;  %v1386_v44 = vadd.f32 %v887_v35, %v418_v28  ;;  %v886_v49 = vunpack.c.l.bf16 %v957_v12  ;;  %v419_v51 = vld [vmem:[#allocation8 + $0x50] sm:$0xff]  ;;  %v960_v52 = vld [vmem:[#allocation7 + $0x38] sm:$0xff]   ;;  %v891_v53 = vunpack.c.h.bf16 %v958_v36 }
  0x48   :  { %445 = vst [vmem:[#allocation14 + $0x20] sm:$0xff] %v1377_v38  ;;  %448 = vst [vmem:[#allocation14 + $0x38] sm:$0xff] %v1379_v39  ;;  %v890_v54 = vunpack.c.l.bf16 %v958_v36  ;;  %v422_v55 = vld [vmem:[#allocation8 + $0x68] sm:$0xff]  ;;  %v895_v57 = vunpack.c.h.bf16 %v959_v41  ;;  %v421_v58 = vld [vmem:[#allocation8 + $0x60] sm:$0xff]  ;;  %v894_v1 = vunpack.c.l.bf16 %v959_v41  ;;  %v899_v2 = vunpack.c.h.bf16 %v960_v52 }
  0x49   :  { %193 = vadd.xlane.f32.xlu1 %v170_v17  ;;  %447 = vst [vmem:[#allocation14 + $0x30] sm:$0xff] %v1384_v43  ;;  %450 = vst [vmem:[#allocation14 + $0x48] sm:$0xff] %v1386_v44  ;;  %v1392_v56 = vadd.f32 %v886_v49, %v417_v40  ;;  %v424_v59 = vld [vmem:[#allocation8 + $0x78] sm:$0xff]  ;;  %v1394_v60 = vadd.f32 %v891_v53, %v420_v50  ;;  %v423_v5 = vld [vmem:[#allocation8 + $0x70] sm:$0xff]  ;;  %v174_v6 = vmul.f32 %v1333_v47, %v1333_v47 }
  0x4a   :  { %191 = vadd.xlane.f32.xlu0 %v169_v18  ;;  %v1396_v61 = vadd.f32 %v890_v54, %v419_v51  ;;  %v173_v7 = vmul.f32 %v1335_v48, %v1335_v48  ;;  %v1403_v8 = vadd.f32 %v895_v57, %v422_v55  ;;  %v898_v9 = vunpack.c.l.bf16 %v960_v52 }
  0x4b   :  { %449 = vst [vmem:[#allocation14 + $0x40] sm:$0xff] %v1392_v56  ;;  %452 = vst [vmem:[#allocation14 + $0x58] sm:$0xff] %v1394_v60  ;;  %v1407_v10 = vadd.f32 %v894_v1, %v421_v58  ;;  %v1409_v11 = vadd.f32 %v899_v2, %v424_v59  ;;  %v176_v17 = vmul.f32 %v1345_v62, %v1345_v62 }
  0x4c   :  { %451 = vst [vmem:[#allocation14 + $0x50] sm:$0xff] %v1396_v61  ;;  %454 = vst [vmem:[#allocation14 + $0x68] sm:$0xff] %v1403_v8  ;;  %v1412_v12 = vadd.f32 %v898_v9, %v423_v5  ;;  %v175_v18 = vmul.f32 %v1347_v63, %v1347_v63  ;;  %v178_v20 = vmul.f32 %v1349_v0, %v1349_v0 }
  0x4d   :  { %197 = vadd.xlane.f32.xlu1 %v172_v37  ;;  %453 = vst [vmem:[#allocation14 + $0x60] sm:$0xff] %v1407_v10  ;;  %456 = vst [vmem:[#allocation14 + $0x78] sm:$0xff] %v1409_v11  ;;  %v177_v21 = vmul.f32 %v1351_v3, %v1351_v3  ;;  %v458_v22 = vmul.f32 %v1353_v4, %v1353_v4  ;;  %v457_v25 = vmul.f32 %v1364_v19, %v1364_v19 }
  0x4e   :  { %195 = vadd.xlane.f32.xlu0 %v171_v42  ;;  %455 = vst [vmem:[#allocation14 + $0x70] sm:$0xff] %v1412_v12  ;;  %v460_v26 = vmul.f32 %v1366_v23, %v1366_v23  ;;  %v459_v27 = vmul.f32 %v1368_v24, %v1368_v24  ;;  %v462_v28 = vmul.f32 %v1371_v29, %v1371_v29 }
  0x4f   :  { %v461_v30 = vmul.f32 %v1377_v38, %v1377_v38  ;;  %v464_v35 = vmul.f32 %v1379_v39, %v1379_v39  ;;  %v463_v36 = vmul.f32 %v1384_v43, %v1384_v43  ;;  %v466_v37 = vmul.f32 %v1386_v44, %v1386_v44 }
  0x50   :  { %v465_v40 = vmul.f32 %v1392_v56, %v1392_v56  ;;  %v468_v41 = vmul.f32 %v1394_v60, %v1394_v60  ;;  %v467_v42 = vmul.f32 %v1396_v61, %v1396_v61  ;;  %v470_v49 = vmul.f32 %v1403_v8, %v1403_v8 }
  0x51   :  { %201 = vadd.xlane.f32.xlu1 %v174_v6  ;;  %v469_v50 = vmul.f32 %v1407_v10, %v1407_v10  ;;  %v472_v51 = vmul.f32 %v1409_v11, %v1409_v11  ;;  %v471_v52 = vmul.f32 %v1412_v12, %v1412_v12 }
  0x52   :  { %199 = vadd.xlane.f32.xlu0 %v173_v7 }
  0x55   :  { %205 = vadd.xlane.f32.xlu1 %v176_v17 }
  0x56   :  { %203 = vadd.xlane.f32.xlu0 %v175_v18 }
  0x59   :  { %209 = vadd.xlane.f32.xlu1 %v178_v20 }
  0x5a   :  { %207 = vadd.xlane.f32.xlu0 %v177_v21 }
  0x5d   :  { %475 = vadd.xlane.f32.xlu1 %v458_v22 }
  0x5e   :  { %473 = vadd.xlane.f32.xlu0 %v457_v25 }
  0x61   :  { %479 = vadd.xlane.f32.xlu1 %v460_v26 }
  0x62   :  { %477 = vadd.xlane.f32.xlu0 %v459_v27 }
  0x65   :  { %483 = vadd.xlane.f32.xlu1 %v462_v28 }
  0x66   :  { %481 = vadd.xlane.f32.xlu0 %v461_v30 }
  0x69   :  { %487 = vadd.xlane.f32.xlu1 %v464_v35 }
  0x6a   :  { %485 = vadd.xlane.f32.xlu0 %v463_v36 }
  0x6d   :  { %491 = vadd.xlane.f32.xlu1 %v466_v37 }
  0x6e   :  { %489 = vadd.xlane.f32.xlu0 %v465_v40 }
  0x71   :  { %495 = vadd.xlane.f32.xlu1 %v468_v41 }
  0x72   :  { %493 = vadd.xlane.f32.xlu0 %v467_v42 }
  0x75   :  { %499 = vadd.xlane.f32.xlu1 %v470_v49 }
  0x76   :  { %497 = vadd.xlane.f32.xlu0 %v469_v50 }
  0x79   :  { %503 = vadd.xlane.f32.xlu1 %v472_v51 }
  0x7a   :  { %501 = vadd.xlane.f32.xlu0 %v471_v52 }
  0x7b   :  { %1135 = shalt.err (!%p1132_p10)
}
  0x7c   :  { %688 = dma.vmem_to_hbm [thread:$0]  %s683_s3, 2048, %s1556_s6, [#allocation12], %s1217_s30, %s1217_s30, %s1218_s9  }
  0x7d   :  { %s1225_s10 = smov [#allocation14]  }
  0x7e   :  { %s706_s11 = sshll.u32 %s1225_s10, 4  ;;  %s707_s11 = int_to_ptr.vmem [resolvable:$true] %s706_s11 }
  0x7f   :  { %s1144_s12 = scalar_lea.vmem %s707_s11, 2048  ;;  %p1149_p12 = scmp.lt.s32.totalorder %s707_s11, %s707_s11 }
  0x80   :  { %p1145_p11 = scmp.ne.s32.totalorder %s707_s11, %s1144_s12  ;;  %p1150_p13 = scmp.lt.s32.totalorder %s1144_s12, %s1144_s12 }
  0x82   :  { %p1151_p0 = por %p1150_p13, %p1149_p12 }
  0x84   :  { %p1152_p1 = pnand %p1151_p0, %p1145_p11 }
  0x86   :  { %1155 = shalt.err (!%p1152_p1)
}
  0x87   :  { %712 = dma.vmem_to_hbm [thread:$0]  %s707_s11, 2048, %s1558_s8, [#allocation15], %s1217_s30, %s1217_s30, %s1218_s9  }
  0xc6   :  { %v184_v53 = vpop.xlane.xlu1 %183 }
  0xc7   :  { %v180_v54 = vpop.xlane.xlu0 %179  ;;  %v213_v55 = vmul.f32 0.0078125, %v184_v53 }
  0xc8   :  { %v211_v57 = vmul.f32 0.0078125, %v180_v54 }
  0xc9   :  { %v229_v58 = vadd.f32 1e-05, %v213_v55 }
  0xca   :  { %v227_v59 = vadd.f32 1e-05, %v211_v57  ;;  %v186_v1 = vpop.xlane.xlu1 %185  ;;  %v1473_v57 = vld [vmem:[%s1554_s4] ss:$0 sm:$0xff]  ;;  %s1226_s4 = smov [#allocation10]  }
  0xcb   :  { %v182_v2 = vpop.xlane.xlu0 %181  ;;  %980 = vrsqrt.f32 %v229_v58  ;;  %v214_v5 = vmul.f32 0.0078125, %v186_v1  ;;  %s670_s30 = sshll.u32 %s1226_s4, 4  ;;  %s671_s30 = int_to_ptr.vmem [resolvable:$true] %s670_s30 }
  0xcc   :  { %v212_v6 = vmul.f32 0.0078125, %v182_v2  ;;  %982 = vrsqrt.f32 %v227_v59  ;;  %s1164_s9 = scalar_lea.vmem %s671_s30, 1024  ;;  %p1169_p3 = scmp.lt.s32.totalorder %s671_s30, %s671_s30 }
  0xcd   :  { %v230_v7 = vadd.f32 1e-05, %v214_v5  ;;  %p1165_p2 = scmp.ne.s32.totalorder %s671_s30, %s1164_s9  ;;  %p1170_p4 = scmp.lt.s32.totalorder %s1164_s9, %s1164_s9 }
  0xce   :  { %v228_v9 = vadd.f32 1e-05, %v212_v6  ;;  %v190_v17 = vpop.xlane.xlu1 %189 }
  0xcf   :  { %v188_v18 = vpop.xlane.xlu0 %187  ;;  %984 = vrsqrt.f32 %v230_v7  ;;  %v216_v20 = vmul.f32 0.0078125, %v190_v17  ;;  %p1171_p5 = por %p1170_p4, %p1169_p3 }
  0xd0   :  { %v215_v21 = vmul.f32 0.0078125, %v188_v18  ;;  %986 = vrsqrt.f32 %v228_v9 }
  0xd1   :  { %v232_v22 = vadd.f32 1e-05, %v216_v20  ;;  %p1172_p6 = pnand %p1171_p5, %p1165_p2 }
  0xd2   :  { %v231_v25 = vadd.f32 1e-05, %v215_v21  ;;  %v194_v26 = vpop.xlane.xlu1 %193 }
  0xd3   :  { %v192_v27 = vpop.xlane.xlu0 %191  ;;  %988 = vrsqrt.f32 %v232_v22  ;;  %v218_v28 = vmul.f32 0.0078125, %v194_v26 }
  0xd4   :  { %v217_v30 = vmul.f32 0.0078125, %v192_v27  ;;  %990 = vrsqrt.f32 %v231_v25 }
  0xd5   :  { %v234_v35 = vadd.f32 1e-05, %v218_v28 }
  0xd6   :  { %v233_v36 = vadd.f32 1e-05, %v217_v30  ;;  %v198_v37 = vpop.xlane.xlu1 %197 }
  0xd7   :  { %v196_v40 = vpop.xlane.xlu0 %195  ;;  %992 = vrsqrt.f32 %v234_v35  ;;  %v220_v41 = vmul.f32 0.0078125, %v198_v37 }
  0xd8   :  { %v219_v42 = vmul.f32 0.0078125, %v196_v40  ;;  %v981_v49 = vpop.eup %980  ;;  %994 = vrsqrt.f32 %v233_v36 }
  0xd9   :  { %v983_v50 = vpop.eup %982  ;;  %v236_v51 = vadd.f32 1e-05, %v220_v41  ;;  %v261_v53 = vmul.f32 %v981_v49, %v1297_v13 }
  0xda   :  { %v235_v52 = vadd.f32 1e-05, %v219_v42  ;;  %v202_v54 = vpop.xlane.xlu1 %201  ;;  %v259_v2 = vmul.f32 %v983_v50, %v1299_v14 }
  0xdb   :  { %v200_v55 = vpop.xlane.xlu0 %199  ;;  %996 = vrsqrt.f32 %v236_v51  ;;  %v222_v58 = vmul.f32 0.0078125, %v202_v54  ;;  %v283_v13 = vmul.f32 %v1473_v57, %v261_v53 }
  0xdc   :  { %v221_v59 = vmul.f32 0.0078125, %v200_v55  ;;  %v985_v1 = vpop.eup %984  ;;  %998 = vrsqrt.f32 %v235_v52  ;;  %v281_v14 = vmul.f32 %v1473_v57, %v259_v2 }
  0xdd   :  { %v987_v5 = vpop.eup %986  ;;  %v262_v6 = vmul.f32 %v985_v1, %v1301_v15  ;;  %v238_v7 = vadd.f32 1e-05, %v222_v58 }
  0xde   :  { %v237_v9 = vadd.f32 1e-05, %v221_v59  ;;  %v260_v17 = vmul.f32 %v987_v5, %v1303_v16  ;;  %v206_v18 = vpop.xlane.xlu1 %205 }
  0xdf   :  { %v204_v20 = vpop.xlane.xlu0 %203  ;;  %v284_v21 = vmul.f32 %v1473_v57, %v262_v6  ;;  %1000 = vrsqrt.f32 %v238_v7  ;;  %v224_v22 = vmul.f32 0.0078125, %v206_v18 }
  0xe0   :  { %v223_v25 = vmul.f32 0.0078125, %v204_v20  ;;  %v989_v26 = vpop.eup %988  ;;  %v282_v27 = vmul.f32 %v1473_v57, %v260_v17  ;;  %1002 = vrsqrt.f32 %v237_v9 }
  0xe1   :  { %v991_v15 = vpop.eup %990  ;;  %v836_v28 = vpack.c.bf16 %v284_v21, %v283_v13  ;;  %v264_v30 = vmul.f32 %v989_v26, %v1317_v31  ;;  %v240_v35 = vadd.f32 1e-05, %v224_v22 }
  0xe2   :  { %v239_v36 = vadd.f32 1e-05, %v223_v25  ;;  %v831_v16 = vpack.c.bf16 %v282_v27, %v281_v14  ;;  %v263_v37 = vmul.f32 %v991_v15, %v1319_v32  ;;  %v210_v40 = vpop.xlane.xlu1 %209 }
  0xe3   :  { %v208_v41 = vpop.xlane.xlu0 %207  ;;  %947 = vst [vmem:[#allocation10 + $0x8] sm:$0xff] %v836_v28   ;;  %v286_v42 = vmul.f32 %v1473_v57, %v264_v30  ;;  %1004 = vrsqrt.f32 %v240_v35  ;;  %v226_v49 = vmul.f32 0.0078125, %v210_v40 }
  0xe4   :  { %v225_v50 = vmul.f32 0.0078125, %v208_v41  ;;  %v993_v51 = vpop.eup %992  ;;  %832 = vst [vmem:[#allocation10] sm:$0xff] %v831_v16   ;;  %v285_v52 = vmul.f32 %v1473_v57, %v263_v37  ;;  %1006 = vrsqrt.f32 %v239_v36 }
  0xe5   :  { %v995_v53 = vpop.eup %994  ;;  %v266_v31 = vmul.f32 %v993_v51, %v1321_v33  ;;  %v242_v54 = vadd.f32 1e-05, %v226_v49 }
  0xe6   :  { %v241_v55 = vadd.f32 1e-05, %v225_v50  ;;  %v841_v58 = vpack.c.bf16 %v286_v42, %v285_v52  ;;  %v265_v32 = vmul.f32 %v995_v53, %v1323_v34  ;;  %v476_v59 = vpop.xlane.xlu1 %475 }
  0xe7   :  { %v474_v1 = vpop.xlane.xlu0 %473  ;;  %v288_v2 = vmul.f32 %v1473_v57, %v266_v31  ;;  %1008 = vrsqrt.f32 %v242_v54  ;;  %v506_v5 = vmul.f32 0.0078125, %v476_v59 }
  0xe8   :  { %v505_v6 = vmul.f32 0.0078125, %v474_v1  ;;  %v997_v7 = vpop.eup %996  ;;  %948 = vst [vmem:[#allocation10 + $0x10] sm:$0xff] %v841_v58   ;;  %v287_v9 = vmul.f32 %v1473_v57, %v265_v32  ;;  %1010 = vrsqrt.f32 %v241_v55 }
  0xe9   :  { %v999_v13 = vpop.eup %998  ;;  %v268_v33 = vmul.f32 %v997_v7, %v1329_v45  ;;  %v522_v17 = vadd.f32 1e-05, %v506_v5 }
  0xea   :  { %v521_v18 = vadd.f32 1e-05, %v505_v6  ;;  %v846_v20 = vpack.c.bf16 %v288_v2, %v287_v9  ;;  %v267_v34 = vmul.f32 %v999_v13, %v1331_v46  ;;  %v480_v21 = vpop.xlane.xlu1 %479 }
  0xeb   :  { %v478_v22 = vpop.xlane.xlu0 %477  ;;  %v290_v25 = vmul.f32 %v1473_v57, %v268_v33  ;;  %1012 = vrsqrt.f32 %v522_v17  ;;  %v508_v26 = vmul.f32 0.0078125, %v480_v21 }
  0xec   :  { %v507_v14 = vmul.f32 0.0078125, %v478_v22  ;;  %v1001_v27 = vpop.eup %1000  ;;  %949 = vst [vmem:[#allocation10 + $0x18] sm:$0xff] %v846_v20   ;;  %v289_v15 = vmul.f32 %v1473_v57, %v267_v34  ;;  %1014 = vrsqrt.f32 %v521_v18 }
  0xed   :  { %v1003_v28 = vpop.eup %1002  ;;  %v270_v45 = vmul.f32 %v1001_v27, %v1333_v47  ;;  %v524_v30 = vadd.f32 1e-05, %v508_v26 }
  0xee   :  { %v523_v35 = vadd.f32 1e-05, %v507_v14  ;;  %v851_v36 = vpack.c.bf16 %v290_v25, %v289_v15  ;;  %v269_v46 = vmul.f32 %v1003_v28, %v1335_v48  ;;  %v484_v16 = vpop.xlane.xlu1 %483 }
  0xef   :  { %v482_v37 = vpop.xlane.xlu0 %481  ;;  %v292_v40 = vmul.f32 %v1473_v57, %v270_v45  ;;  %1016 = vrsqrt.f32 %v524_v30  ;;  %v510_v41 = vmul.f32 0.0078125, %v484_v16 }
  0xf0   :  { %v509_v42 = vmul.f32 0.0078125, %v482_v37  ;;  %v1005_v49 = vpop.eup %1004  ;;  %950 = vst [vmem:[#allocation10 + $0x20] sm:$0xff] %v851_v36   ;;  %v291_v50 = vmul.f32 %v1473_v57, %v269_v46  ;;  %1018 = vrsqrt.f32 %v523_v35 }
  0xf1   :  { %v1007_v51 = vpop.eup %1006  ;;  %v272_v47 = vmul.f32 %v1005_v49, %v1345_v62  ;;  %v526_v52 = vadd.f32 1e-05, %v510_v41 }
  0xf2   :  { %v525_v53 = vadd.f32 1e-05, %v509_v42  ;;  %v856_v31 = vpack.c.bf16 %v292_v40, %v291_v50  ;;  %v271_v48 = vmul.f32 %v1007_v51, %v1347_v63  ;;  %v488_v54 = vpop.xlane.xlu1 %487 }
  0xf3   :  { %v486_v55 = vpop.xlane.xlu0 %485  ;;  %v294_v58 = vmul.f32 %v1473_v57, %v272_v47  ;;  %1020 = vrsqrt.f32 %v526_v52  ;;  %v512_v32 = vmul.f32 0.0078125, %v488_v54 }
  0xf4   :  { %v511_v59 = vmul.f32 0.0078125, %v486_v55  ;;  %v1009_v1 = vpop.eup %1008  ;;  %951 = vst [vmem:[#allocation10 + $0x28] sm:$0xff] %v856_v31   ;;  %v293_v2 = vmul.f32 %v1473_v57, %v271_v48  ;;  %1022 = vrsqrt.f32 %v525_v53 }
  0xf5   :  { %v1011_v5 = vpop.eup %1010  ;;  %v274_v62 = vmul.f32 %v1009_v1, %v1349_v0  ;;  %v528_v6 = vadd.f32 1e-05, %v512_v32 }
  0xf6   :  { %v527_v7 = vadd.f32 1e-05, %v511_v59  ;;  %v861_v9 = vpack.c.bf16 %v294_v58, %v293_v2  ;;  %v273_v63 = vmul.f32 %v1011_v5, %v1351_v3  ;;  %v492_v13 = vpop.xlane.xlu1 %491 }
  0xf7   :  { %v490_v33 = vpop.xlane.xlu0 %489  ;;  %v296_v17 = vmul.f32 %v1473_v57, %v274_v62  ;;  %1024 = vrsqrt.f32 %v528_v6  ;;  %v514_v18 = vmul.f32 0.0078125, %v492_v13 }
  0xf8   :  { %v513_v20 = vmul.f32 0.0078125, %v490_v33  ;;  %v1013_v34 = vpop.eup %1012  ;;  %952 = vst [vmem:[#allocation10 + $0x30] sm:$0xff] %v861_v9   ;;  %v295_v21 = vmul.f32 %v1473_v57, %v273_v63  ;;  %1026 = vrsqrt.f32 %v527_v7 }
  0xf9   :  { %v1015_v0 = vpop.eup %1014  ;;  %v554_v22 = vmul.f32 %v1013_v34, %v1353_v4  ;;  %v530_v25 = vadd.f32 1e-05, %v514_v18 }
  0xfa   :  { %v529_v26 = vadd.f32 1e-05, %v513_v20  ;;  %v866_v3 = vpack.c.bf16 %v296_v17, %v295_v21  ;;  %v553_v14 = vmul.f32 %v1015_v0, %v1364_v19  ;;  %v496_v27 = vpop.xlane.xlu1 %495 }
  0xfb   :  { %v494_v15 = vpop.xlane.xlu0 %493  ;;  %v570_v28 = vmul.f32 %v1473_v57, %v554_v22  ;;  %1028 = vrsqrt.f32 %v530_v25  ;;  %v516_v45 = vmul.f32 0.0078125, %v496_v27 }
  0xfc   :  { %v515_v30 = vmul.f32 0.0078125, %v494_v15  ;;  %v1017_v35 = vpop.eup %1016  ;;  %953 = vst [vmem:[#allocation10 + $0x38] sm:$0xff] %v866_v3   ;;  %v569_v36 = vmul.f32 %v1473_v57, %v553_v14  ;;  %1030 = vrsqrt.f32 %v529_v26 }
  0xfd   :  { %v1019_v46 = vpop.eup %1018  ;;  %v556_v4 = vmul.f32 %v1017_v35, %v1366_v23  ;;  %v532_v16 = vadd.f32 1e-05, %v516_v45 }
  0xfe   :  { %v531_v37 = vadd.f32 1e-05, %v515_v30 }
  0xff   :  { %1175 = shalt.err (!%p1172_p6)
}
 0x100   :  { %676 = dma.vmem_to_hbm [thread:$0]  %s671_s30, 1024, %s1555_s5, [#allocation4], %s1220_s15, %s1220_s15, %s1221_s16   ;;  %v903_v19 = vpack.c.bf16 %v570_v28, %v569_v36  ;;  %v555_v40 = vmul.f32 %v1019_v46, %v1368_v24  ;;  %v500_v23 = vpop.xlane.xlu1 %499  ;;  %v498_v41 = vpop.xlane.xlu0 %497  ;;  %v572_v42 = vmul.f32 %v1473_v57, %v556_v4  ;;  %1032 = vrsqrt.f32 %v532_v16 }
 0x101   :  { %v518_v49 = vmul.f32 0.0078125, %v500_v23  ;;  %v517_v50 = vmul.f32 0.0078125, %v498_v41  ;;  %v1021_v51 = vpop.eup %1020  ;;  %1034 = vrsqrt.f32 %v531_v37  ;;  %s1227_s5 = smov [#allocation13]  }
 0x102   :  { %904 = vst [vmem:[#allocation13] sm:$0xff] %v903_v19   ;;  %v571_v47 = vmul.f32 %v1473_v57, %v555_v40  ;;  %v1023_v52 = vpop.eup %1022  ;;  %v558_v53 = vmul.f32 %v1021_v51, %v1371_v29  ;;  %s694_s1 = sshll.u32 %s1227_s5, 4  ;;  %s695_s1 = int_to_ptr.vmem [resolvable:$true] %s694_s1 }
 0x103   :  { %v534_v31 = vadd.f32 1e-05, %v518_v49  ;;  %v533_v48 = vadd.f32 1e-05, %v517_v50  ;;  %v557_v24 = vmul.f32 %v1023_v52, %v1377_v38  ;;  %s1184_s19 = scalar_lea.vmem %s695_s1, 1024  ;;  %p1189_p8 = scmp.lt.s32.totalorder %s695_s1, %s695_s1 }
 0x104   :  { %v908_v54 = vpack.c.bf16 %v572_v42, %v571_v47  ;;  %v504_v55 = vpop.xlane.xlu1 %503  ;;  %v502_v58 = vpop.xlane.xlu0 %501  ;;  %v574_v32 = vmul.f32 %v1473_v57, %v558_v53  ;;  %p1185_p7 = scmp.ne.s32.totalorder %s695_s1, %s1184_s19  ;;  %p1190_p9 = scmp.lt.s32.totalorder %s1184_s19, %s1184_s19 }
 0x105   :  { %1036 = vrsqrt.f32 %v534_v31  ;;  %v520_v59 = vmul.f32 0.0078125, %v504_v55  ;;  %v519_v1 = vmul.f32 0.0078125, %v502_v58  ;;  %v1025_v2 = vpop.eup %1024  ;;  %v573_v5 = vmul.f32 %v1473_v57, %v557_v24 }
 0x106   :  { %961 = vst [vmem:[#allocation13 + $0x8] sm:$0xff] %v908_v54   ;;  %1038 = vrsqrt.f32 %v533_v48  ;;  %v1027_v62 = vpop.eup %1026  ;;  %v560_v29 = vmul.f32 %v1025_v2, %v1379_v39  ;;  %p1191_p10 = por %p1190_p9, %p1189_p8 }
 0x107   :  { %v536_v6 = vadd.f32 1e-05, %v520_v59  ;;  %v535_v7 = vadd.f32 1e-05, %v519_v1  ;;  %v913_v9 = vpack.c.bf16 %v574_v32, %v573_v5  ;;  %v559_v38 = vmul.f32 %v1027_v62, %v1384_v43 }
 0x108   :  { %v576_v63 = vmul.f32 %v1473_v57, %v560_v29  ;;  %v1029_v13 = vpop.eup %1028  ;;  %p1192_p11 = pnand %p1191_p10, %p1185_p7 }
 0x109   :  { %1040 = vrsqrt.f32 %v536_v6  ;;  %962 = vst [vmem:[#allocation13 + $0x10] sm:$0xff] %v913_v9   ;;  %v575_v33 = vmul.f32 %v1473_v57, %v559_v38  ;;  %v1031_v17 = vpop.eup %1030  ;;  %v562_v18 = vmul.f32 %v1029_v13, %v1386_v44 }
 0x10a   :  { %1042 = vrsqrt.f32 %v535_v7  ;;  %v561_v34 = vmul.f32 %v1031_v17, %v1392_v56 }
 0x10b   :  { %v918_v20 = vpack.c.bf16 %v576_v63, %v575_v33  ;;  %v578_v39 = vmul.f32 %v1473_v57, %v562_v18 }
 0x10c   :  { %v577_v43 = vmul.f32 %v1473_v57, %v561_v34 }
 0x10d   :  { %v1033_v21 = vpop.eup %1032  ;;  %963 = vst [vmem:[#allocation13 + $0x18] sm:$0xff] %v918_v20  }
 0x10e   :  { %v1035_v0 = vpop.eup %1034  ;;  %v564_v22 = vmul.f32 %v1033_v21, %v1394_v60  ;;  %v923_v25 = vpack.c.bf16 %v578_v39, %v577_v43 }
 0x10f   :  { %v563_v26 = vmul.f32 %v1035_v0, %v1396_v61 }
 0x110   :  { %v580_v3 = vmul.f32 %v1473_v57, %v564_v22  ;;  %964 = vst [vmem:[#allocation13 + $0x20] sm:$0xff] %v923_v25  }
 0x111   :  { %v579_v44 = vmul.f32 %v1473_v57, %v563_v26 }
 0x112   :  { %v1037_v14 = vpop.eup %1036 }
 0x113   :  { %v1039_v27 = vpop.eup %1038  ;;  %v566_v56 = vmul.f32 %v1037_v14, %v1403_v8  ;;  %v928_v15 = vpack.c.bf16 %v580_v3, %v579_v44 }
 0x114   :  { %v565_v28 = vmul.f32 %v1039_v27, %v1407_v10 }
 0x115   :  { %v582_v45 = vmul.f32 %v1473_v57, %v566_v56  ;;  %965 = vst [vmem:[#allocation13 + $0x28] sm:$0xff] %v928_v15  }
 0x116   :  { %v1041_v30 = vpop.eup %1040  ;;  %v581_v60 = vmul.f32 %v1473_v57, %v565_v28 }
 0x117   :  { %v1043_v35 = vpop.eup %1042  ;;  %v568_v61 = vmul.f32 %v1041_v30, %v1409_v11 }
 0x118   :  { %v933_v36 = vpack.c.bf16 %v582_v45, %v581_v60  ;;  %v567_v46 = vmul.f32 %v1043_v35, %v1412_v12 }
 0x119   :  { %v584_v4 = vmul.f32 %v1473_v57, %v568_v61 }
 0x11a   :  { %966 = vst [vmem:[#allocation13 + $0x30] sm:$0xff] %v933_v36   ;;  %v583_v8 = vmul.f32 %v1473_v57, %v567_v46 }
 0x11c   :  { %v938_v10 = vpack.c.bf16 %v584_v4, %v583_v8 }
 0x11e   :  { %967 = vst [vmem:[#allocation13 + $0x38] sm:$0xff] %v938_v10  }
 0x11f   :  { %1195 = shalt.err (!%p1192_p11)
}
 0x120   :  { %700 = dma.vmem_to_hbm [thread:$0]  %s695_s1, 1024, %s1557_s7, [#allocation12], %s1220_s15, %s1220_s15, %s1221_s16  }
 0x121   :  { %1210 = dma.done.wait [#allocation4], 1024  }
 0x122   :  { %1211 = vsyncadd [#allocation4], 4294966272 }
 0x123   :  { %1212 = dma.done.wait [#allocation12], 3072  }
 0x124   :  { %1213 = vsyncadd [#allocation12], 4294964224 }
 0x125   :  { %1214 = dma.done.wait [#allocation15], 2048  }
 0x126   :  { %1215 = vsyncadd [#allocation15], 4294965248 }
 0x127   :  { %725 = vsyncpa [#allocation3], 1 }
 0x128   :  { %726 = vsyncpa [#allocation6], 1 }
 0x129   :  { %727 = vsyncpa [#allocation9], 1 }
 0x12a   :  { %728 = vsyncpa [#allocation4], 1 }
 0x12b   :  { %729 = vsyncpa [#allocation12], 1 }
 0x12c   :  { %730 = vsyncpa [#allocation15], 1 }

</bundles_post_ra>
